<compile_context>
chip_gen: v7x
topology: tpu7x:2x2x1
jax: 0.10.0
libtpu: 0.0.40
codegen_flags: <defaults>
</compile_context>

<pallas_src>
import functools

import jax
import jax.numpy as jnp
from jax.experimental import pallas as pl
from jax.experimental.pallas import tpu as pltpu

_LANE = 128      # lane granularity (last dim)
_SUBLANE = 8     # f32 sublane granularity (second-to-last dim)


def _round_up(v: int, m: int) -> int:
    return (v + m - 1) // m * m


def _vmem_capacity_bytes() -> int:
    """Physical VMEM of the local chip; conservative fallback if unqueryable."""
    try:
        return int(pltpu.get_tpu_info().vmem_capacity_bytes)
    except Exception:
        return 64 << 20          # v7x per-TensorCore VMEM (smallest of the gens)


def _fused_mlp_kernel(*refs, n_layers: int, compute_dtype):
    """refs = (x_ref, w0, b0, w1, b1, ..., o_ref).

    x_ref: (tm, K0p) at compute dtype.  w_i: (Kp_i, Np_i) at compute dtype.
    b_i: (1, Np_i) f32.  o_ref: (tm, Np_last) at the caller's dtype.
    Matmuls accumulate in f32; bias + ReLU run in f32.  Padded lanes stay
    exactly zero (zero weights / zero bias / ReLU(0)=0), so they never
    contaminate real outputs.
    """
    x_ref = refs[0]
    o_ref = refs[-1]
    wb_refs = refs[1:-1]

    h = x_ref[...]                       # already at compute dtype
    for i in range(n_layers):
        w = wb_refs[2 * i][...]
        b = wb_refs[2 * i + 1][...].astype(jnp.float32)
        acc = jnp.dot(h.astype(compute_dtype), w.astype(compute_dtype),
                      preferred_element_type=jnp.float32)
        acc = acc + b
        if i < n_layers - 1:             # ReLU after every layer except the last
            acc = jnp.maximum(acc, 0.0)
        h = acc
    o_ref[...] = h.astype(o_ref.dtype)


def init_mlp_params(key, input_dim, output_dim, dim=256, n_layer=1,
                    dtype=jnp.float32):
    """Mirror nn.Linear default init (uniform +-1/sqrt(fan_in)).

    Weights are stored (in_features, out_features) — transpose of torch's
    (out, in) — so the kernel computes x @ W directly.
    """
    sizes = [(input_dim, dim)] + [(dim, dim)] * n_layer + [(dim, output_dim)]
    params = []
    for fan_in, fan_out in sizes:
        key, kw, kb = jax.random.split(key, 3)
        bound = 1.0 / (fan_in ** 0.5)
        w = jax.random.uniform(kw, (fan_in, fan_out), dtype, -bound, bound)
        b = jax.random.uniform(kb, (fan_out,), dtype, -bound, bound)
        params.append((w, b))
    return params


def prepare_params(params, compute_dtype=jnp.bfloat16):
    """Zero-pad every layer's (in, out) dims to multiples of 128 and cast
    the weights to the MXU compute dtype (bf16 by default).  Biases stay f32
    (they are added on the f32 accumulator).  Done once, outside the hot path.
    """
    padded = []
    for w, b in params:
        k, n = w.shape
        kp, npad = _round_up(k, _LANE), _round_up(n, _LANE)
        wp = jnp.zeros((kp, npad), compute_dtype).at[:k, :n].set(
            w.astype(compute_dtype))
        bp = jnp.zeros((1, npad), jnp.float32).at[0, :n].set(
            b.astype(jnp.float32))
        padded.append((wp, bp))
    return padded


@functools.partial(jax.jit, static_argnames=("input_dim", "output_dim"))
def mlp_forward(padded_params, x, *, input_dim, output_dim):
    """Forward pass. x: NCHW (B, C, H, W) or already (B, input_dim).

    The MXU compute dtype is taken from the prepared weights, so
    prepare_params and mlp_forward cannot disagree.
    """
    B = x.shape[0]
    h = x.reshape(B, -1)                      # == x.view(x.size(0), -1)
    assert h.shape[1] == input_dim

    compute_dtype = padded_params[0][0].dtype
    k0p = padded_params[0][0].shape[0]        # padded first in-dim
    nlp = padded_params[-1][0].shape[1]       # padded last out-dim
    n_layers = len(padded_params)
    out_dtype = x.dtype

    # Resident (single-buffered) weight + bias bytes, and VMEM budget.
    wb_bytes = sum(int(w.size) * w.dtype.itemsize + int(b.size) * b.dtype.itemsize
                   for w, b in padded_params)
    capacity = _vmem_capacity_bytes()
    budget_cap = min(int(capacity * 0.80), capacity - (8 << 20))

    # Batch tile: big tiles amortize the ~0.35us/step pipeline overhead; for
    # B >= 16 pick ceil(B/2) so the "parallel" axis has >= 2 tiles (keeps both
    # v7x TensorCores busy); 128-align large tiles for the v5e 4x128 MXU.
    if B >= 2 * _SUBLANE:
        tm = _round_up(-(-B // 2), _SUBLANE)
    else:
        tm = _round_up(max(B, 1), _SUBLANE)
    if tm > _LANE:
        tm = _round_up(tm, _LANE)
    tm = min(tm, 512)
    row_bytes = (k0p * jnp.dtype(compute_dtype).itemsize
                 + nlp * jnp.dtype(out_dtype).itemsize)
    # Shrink the tile if double-buffered x/out tiles don't fit beside the
    # resident weights.
    while tm > _SUBLANE and wb_bytes + 2 * tm * row_bytes + (4 << 20) > budget_cap:
        tm = max(_SUBLANE, _round_up(tm // 2, _SUBLANE))
    b_pad = _round_up(B, tm)

    # Skip the padded host-side copy when nothing actually needs padding or
    # recasting (avoids a second full pass over the activations in HBM).
    need_pad = (b_pad != B) or (k0p != input_dim) or (h.dtype != compute_dtype)
    if need_pad:
        xp = jnp.zeros((b_pad, k0p), compute_dtype).at[:B, :input_dim].set(
            h.astype(compute_dtype))
    else:
        xp = h

    # Specs: x/out stream per batch tile (double-buffered by default); the
    # grid-invariant weights/biases are single-buffered.
    in_specs = [pl.BlockSpec((tm, k0p), lambda i: (i, 0))]
    inputs = [xp]
    for wp, bp in padded_params:
        kp, npad = wp.shape
        in_specs.append(pl.BlockSpec((kp, npad), lambda i: (0, 0),
                                     pipeline_mode=pl.Buffered(1)))
        in_specs.append(pl.BlockSpec((1, npad), lambda i: (0, 0),
                                     pipeline_mode=pl.Buffered(1)))
        inputs += [wp, bp]
    out_specs = pl.BlockSpec((tm, nlp), lambda i: (i, 0))

    needed = wb_bytes + 2 * tm * row_bytes + (4 << 20)
    vmem_limit = int(min(max(needed, 32 << 20), budget_cap))

    kernel = functools.partial(_fused_mlp_kernel, n_layers=n_layers,
                               compute_dtype=compute_dtype)
    out = pl.pallas_call(
        kernel,
        out_shape=jax.ShapeDtypeStruct((b_pad, nlp), out_dtype),
        grid_spec=pltpu.PrefetchScalarGridSpec(
            num_scalar_prefetch=0,
            grid=(b_pad // tm,),
            in_specs=in_specs,
            out_specs=out_specs,
        ),
        compiler_params=pltpu.CompilerParams(
            dimension_semantics=("parallel",),   # batch tiles -> both TCs (v7x)
            vmem_limit_bytes=vmem_limit,
        ),
    )(*inputs)

    return out[:B, :output_dim]


if __name__ == "__main__":
    key = jax.random.PRNGKey(0)
    kx, kp = jax.random.split(key)

    # Small shapes consistent with the module: batch=2, channels=4, spatial=16.
    B, C, H, W = 2, 4, 16, 16
    input_dim = C * H * W          # 1024 after flatten
    output_dim = 16
    dim = 256                      # module default hidden dim
    n_layer = 1

    x = jax.random.normal(kx, (B, C, H, W), dtype=jnp.float32)
    params = init_mlp_params(kp, input_dim, output_dim, dim=dim,
                             n_layer=n_layer)

    # Plain-JAX f32 reference (same math, same params).
    href = x.reshape(B, -1)
    for i, (w, b) in enumerate(params):
        href = href @ w + b
        if i < len(params) - 1:
            href = jnp.maximum(href, 0.0)

    # 1) Strict f32 MXU path: tight numeric check.
    out_f32 = mlp_forward(prepare_params(params, compute_dtype=jnp.float32), x,
                          input_dim=input_dim, output_dim=output_dim)
    jax.block_until_ready(out_f32)
    assert out_f32.shape == (B, output_dim)
    assert jnp.allclose(out_f32, href, atol=1e-4, rtol=1e-4), \
        float(jnp.max(jnp.abs(out_f32 - href)))

    # 2) Default bf16 MXU path (f32 accumulation): mixed-precision tolerance.
    out_bf16 = mlp_forward(prepare_params(params), x,
                           input_dim=input_dim, output_dim=output_dim)
    jax.block_until_ready(out_bf16)
    assert out_bf16.shape == (B, output_dim)
    assert jnp.allclose(out_bf16, href, atol=5e-2, rtol=5e-2), \
        float(jnp.max(jnp.abs(out_bf16 - href)))

    print("KERNEL_OK")
</pallas_src>

<mosaic_0001>
module attributes {stable_mosaic.version = 11 : i64} {
  func.func @_fused_mlp_kernel(%arg0: i32, %arg1: memref<8x1024xf32, #tpu.memory_space<vmem>>, %arg2: memref<1024x256xf32, #tpu.memory_space<vmem>>, %arg3: memref<1x256xf32, #tpu.memory_space<vmem>>, %arg4: memref<256x256xf32, #tpu.memory_space<vmem>>, %arg5: memref<1x256xf32, #tpu.memory_space<vmem>>, %arg6: memref<256x128xf32, #tpu.memory_space<vmem>>, %arg7: memref<1x128xf32, #tpu.memory_space<vmem>>, %arg8: memref<8x128xf32, #tpu.memory_space<vmem>>) attributes {dimension_semantics = [#tpu.dimension_semantics<parallel>], iteration_bounds = array<i64: 1>, scalar_prefetch = 0 : i64, scratch_operands = 0 : i64, tpu.core_type = #tpu.core_type<tc>, window_params = [{transform_indices = @transform_0, window_bounds = array<i64: 8, 1024>}, {pipeline_mode = #tpu.pipeline_mode<synchronous>, transform_indices = @transform_1, window_bounds = array<i64: 1024, 256>}, {pipeline_mode = #tpu.pipeline_mode<synchronous>, transform_indices = @transform_2, window_bounds = array<i64: 1, 256>}, {pipeline_mode = #tpu.pipeline_mode<synchronous>, transform_indices = @transform_3, window_bounds = array<i64: 256, 256>}, {pipeline_mode = #tpu.pipeline_mode<synchronous>, transform_indices = @transform_4, window_bounds = array<i64: 1, 256>}, {pipeline_mode = #tpu.pipeline_mode<synchronous>, transform_indices = @transform_5, window_bounds = array<i64: 256, 128>}, {pipeline_mode = #tpu.pipeline_mode<synchronous>, transform_indices = @transform_6, window_bounds = array<i64: 1, 128>}, {transform_indices = @transform_7, window_bounds = array<i64: 8, 128>}]} {
    %c0 = arith.constant 0 : index
    %c0_0 = arith.constant 0 : index
    %0 = vector.load %arg1[%c0, %c0_0] : memref<8x1024xf32, #tpu.memory_space<vmem>>, vector<8x1024xf32>
    %c0_1 = arith.constant 0 : index
    %c0_2 = arith.constant 0 : index
    %1 = vector.load %arg2[%c0_1, %c0_2] : memref<1024x256xf32, #tpu.memory_space<vmem>>, vector<1024x256xf32>
    %c0_3 = arith.constant 0 : index
    %c0_4 = arith.constant 0 : index
    %2 = vector.load %arg3[%c0_3, %c0_4] : memref<1x256xf32, #tpu.memory_space<vmem>>, vector<1x256xf32>
    %cst = arith.constant dense<0.000000e+00> : vector<8x256xf32>
    %3 = tpu.matmul %0, %1, %cst {dimension_numbers = #tpu.dot_dimension_numbers<[1], [0], [0], [1], [0, 0, 1, 1], [], []>} : vector<8x1024xf32>, vector<1024x256xf32>, vector<8x256xf32> -> vector<8x256xf32>
    %4 = vector.broadcast %2 : vector<1x256xf32> to vector<8x256xf32>
    %5 = arith.addf %3, %4 : vector<8x256xf32>
    %cst_5 = arith.constant 0.000000e+00 : f32
    %6 = vector.broadcast %cst_5 : f32 to vector<8x256xf32>
    %7 = arith.maximumf %5, %6 : vector<8x256xf32>
    %c0_6 = arith.constant 0 : index
    %c0_7 = arith.constant 0 : index
    %8 = vector.load %arg4[%c0_6, %c0_7] : memref<256x256xf32, #tpu.memory_space<vmem>>, vector<256x256xf32>
    %c0_8 = arith.constant 0 : index
    %c0_9 = arith.constant 0 : index
    %9 = vector.load %arg5[%c0_8, %c0_9] : memref<1x256xf32, #tpu.memory_space<vmem>>, vector<1x256xf32>
    %cst_10 = arith.constant dense<0.000000e+00> : vector<8x256xf32>
    %10 = tpu.matmul %7, %8, %cst_10 {dimension_numbers = #tpu.dot_dimension_numbers<[1], [0], [0], [1], [0, 0, 1, 1], [], []>} : vector<8x256xf32>, vector<256x256xf32>, vector<8x256xf32> -> vector<8x256xf32>
    %11 = vector.broadcast %9 : vector<1x256xf32> to vector<8x256xf32>
    %12 = arith.addf %10, %11 : vector<8x256xf32>
    %cst_11 = arith.constant 0.000000e+00 : f32
    %13 = vector.broadcast %cst_11 : f32 to vector<8x256xf32>
    %14 = arith.maximumf %12, %13 : vector<8x256xf32>
    %c0_12 = arith.constant 0 : index
    %c0_13 = arith.constant 0 : index
    %15 = vector.load %arg6[%c0_12, %c0_13] : memref<256x128xf32, #tpu.memory_space<vmem>>, vector<256x128xf32>
    %c0_14 = arith.constant 0 : index
    %c0_15 = arith.constant 0 : index
    %16 = vector.load %arg7[%c0_14, %c0_15] : memref<1x128xf32, #tpu.memory_space<vmem>>, vector<1x128xf32>
    %cst_16 = arith.constant dense<0.000000e+00> : vector<8x128xf32>
    %17 = tpu.matmul %14, %15, %cst_16 {dimension_numbers = #tpu.dot_dimension_numbers<[1], [0], [0], [1], [0, 0, 1, 1], [], []>} : vector<8x256xf32>, vector<256x128xf32>, vector<8x128xf32> -> vector<8x128xf32>
    %18 = vector.broadcast %16 : vector<1x128xf32> to vector<8x128xf32>
    %19 = arith.addf %17, %18 : vector<8x128xf32>
    %c0_17 = arith.constant 0 : index
    %c0_18 = arith.constant 0 : index
    %20 = vector.load %arg8[%c0_17, %c0_18] : memref<8x128xf32, #tpu.memory_space<vmem>>, vector<8x128xf32>
    tpu.vector_store %arg8[%c0_17, %c0_18], %19 {strides = array<i32>} : memref<8x128xf32, #tpu.memory_space<vmem>>, vector<8x128xf32>,
    return
  }
  func.func @transform_0(%arg0: i32) -> (i32, i32) {
    %c0_i32 = arith.constant 0 : i32
    %c0_i32_0 = arith.constant 0 : i32
    return %arg0, %c0_i32 : i32, i32
  }
  func.func @transform_1(%arg0: i32) -> (i32, i32) {
    %c0_i32 = arith.constant 0 : i32
    %c0_i32_0 = arith.constant 0 : i32
    %c0_i32_1 = arith.constant 0 : i32
    return %c0_i32, %c0_i32_0 : i32, i32
  }
  func.func @transform_2(%arg0: i32) -> (i32, i32) {
    %c0_i32 = arith.constant 0 : i32
    %c0_i32_0 = arith.constant 0 : i32
    %c0_i32_1 = arith.constant 0 : i32
    return %c0_i32, %c0_i32_0 : i32, i32
  }
  func.func @transform_3(%arg0: i32) -> (i32, i32) {
    %c0_i32 = arith.constant 0 : i32
    %c0_i32_0 = arith.constant 0 : i32
    %c0_i32_1 = arith.constant 0 : i32
    return %c0_i32, %c0_i32_0 : i32, i32
  }
  func.func @transform_4(%arg0: i32) -> (i32, i32) {
    %c0_i32 = arith.constant 0 : i32
    %c0_i32_0 = arith.constant 0 : i32
    %c0_i32_1 = arith.constant 0 : i32
    return %c0_i32, %c0_i32_0 : i32, i32
  }
  func.func @transform_5(%arg0: i32) -> (i32, i32) {
    %c0_i32 = arith.constant 0 : i32
    %c0_i32_0 = arith.constant 0 : i32
    %c0_i32_1 = arith.constant 0 : i32
    return %c0_i32, %c0_i32_0 : i32, i32
  }
  func.func @transform_6(%arg0: i32) -> (i32, i32) {
    %c0_i32 = arith.constant 0 : i32
    %c0_i32_0 = arith.constant 0 : i32
    %c0_i32_1 = arith.constant 0 : i32
    return %c0_i32, %c0_i32_0 : i32, i32
  }
  func.func @transform_7(%arg0: i32) -> (i32, i32) {
    %c0_i32 = arith.constant 0 : i32
    %c0_i32_0 = arith.constant 0 : i32
    return %arg0, %c0_i32 : i32, i32
  }
}

</mosaic_0001>

<bundles_post_ra>
// kernel: mlp_forward.1
= control target key start
LH: loop header
LB: loop body
LE: loop exit
PB: predicated region body
PF: predicated region fallthrough
CT: control target
= control target key end

     0   :  { %12 = vsyncpa [#allocation3], 0  ;;  %s1505_s0 = inlined_call_operand.vmem [shape: f32[8,1024], index: 0, kind: input, shape index: {}]   ;;  %s1506_s1 = inlined_call_operand.hbm [shape: f32[1024,256], index: 1, kind: input, shape index: {}]   ;;  %s1507_s2 = inlined_call_operand.vmem [shape: f32[1,256], index: 2, kind: input, shape index: {}]   ;;  %s1508_s3 = inlined_call_operand.hbm [shape: f32[256,256], index: 3, kind: input, shape index: {}]   ;;  %s1509_s4 = inlined_call_operand.vmem [shape: f32[1,256], index: 4, kind: input, shape index: {}]   ;;  %s1510_s5 = inlined_call_operand.hbm [shape: f32[256,128], index: 5, kind: input, shape index: {}]   ;;  %s1511_s6 = inlined_call_operand.vmem [shape: f32[1,128], index: 6, kind: input, shape index: {}]   ;;  %s1512_s7 = inlined_call_operand.vmem [shape: f32[8,128], index: 7, kind: output, shape index: {}]  }
   0x1   :  { %13 = vsyncpa [#allocation5], 0  ;;  %s1367_s24 = smov [#allocation4]   ;;  %s1368_s26 = smov [#allocation2]  }
   0x2   :  { %s35_s25 = sshll.u32 %s1367_s24, 4  ;;  %s21_s27 = sshll.u32 %s1368_s26, 4  ;;  %s36_s25 = int_to_ptr.vmem [resolvable:$true] %s35_s25  ;;  %s1414_s27 = int_to_ptr.vmem [resolvable:$true] %s21_s27 }
   0x3   :  { %s1297_s30 = scalar_lea.hbm %s1508_s3, 8192 }
   0x4   :  { %p1298_p0 = scmp.ne.s32.totalorder %s1508_s3, %s1297_s30  ;;  %p1301_p1 = scmp.lt.u32.totalorder %s1297_s30, %s1508_s3 }
   0x6   :  { %p1303_p2 = pnand %p1301_p1, %p1298_p0 }
   0x8   :  { %1306 = shalt.err (!%p1303_p2)
}
   0x9   :  { %s1307_s12 = scalar_lea.vmem %s36_s25, 8192  ;;  %p1312_p4 = scmp.lt.s32.totalorder %s36_s25, %s36_s25 }
   0xa   :  { %p1308_p3 = scmp.ne.s32.totalorder %s36_s25, %s1307_s12  ;;  %p1313_p5 = scmp.lt.s32.totalorder %s1307_s12, %s1307_s12 }
   0xc   :  { %p1314_p6 = por %p1313_p5, %p1312_p4 }
   0xe   :  { %p1315_p7 = pnand %p1314_p6, %p1308_p3 }
  0x10   :  { %1318 = shalt.err (!%p1315_p7)
}
  0x11   :  { %s1369_s13 = smov 256   ;;  %s1370_s14 = smov 16  }
  0x12   :  { %41 = dma.hbm_to_vmem [thread:$0]  %s1508_s3, 8192, %s36_s25, [#allocation5], %s1369_s13, %s1369_s13, %s1370_s14  }
  0x13   :  { %s1319_s19 = scalar_lea.hbm %s1506_s1, 32768 }
  0x14   :  { %p1320_p8 = scmp.ne.s32.totalorder %s1506_s1, %s1319_s19  ;;  %p1323_p9 = scmp.lt.u32.totalorder %s1319_s19, %s1506_s1 }
  0x16   :  { %p1325_p10 = pnand %p1323_p9, %p1320_p8 }
  0x18   :  { %1328 = shalt.err (!%p1325_p10)
}
  0x19   :  { %s1329_s24 = scalar_lea.vmem %s1414_s27, 32768  ;;  %p1334_p12 = scmp.lt.s32.totalorder %s1414_s27, %s1414_s27 }
  0x1a   :  { %p1330_p11 = scmp.ne.s32.totalorder %s1414_s27, %s1329_s24  ;;  %p1335_p13 = scmp.lt.s32.totalorder %s1329_s24, %s1329_s24 }
  0x1c   :  { %p1336_p0 = por %p1335_p13, %p1334_p12 }
  0x1e   :  { %p1337_p1 = pnand %p1336_p0, %p1330_p11 }
  0x20   :  { %1340 = shalt.err (!%p1337_p1)
}
  0x21   :  { %27 = dma.hbm_to_vmem [thread:$0]  %s1506_s1, 32768, %s1414_s27, [#allocation3], %s1369_s13, %s1369_s13, %s1370_s14  }
  0x22   :  { %s1371_s26 = smov [#allocation6]   ;;  %s1341_s8 = scalar_lea.hbm %s1510_s5, 4096 }
  0x23   :  { %s49_s28 = sshll.u32 %s1371_s26, 4  ;;  %p1342_p2 = scmp.ne.s32.totalorder %s1510_s5, %s1341_s8  ;;  %s50_s28 = int_to_ptr.vmem [resolvable:$true] %s49_s28 }
  0x24   :  { %p1345_p3 = scmp.lt.u32.totalorder %s1341_s8, %s1510_s5 }
  0x26   :  { %p1347_p4 = pnand %p1345_p3, %p1342_p2 }
  0x28   :  { %1350 = shalt.err (!%p1347_p4)
}
  0x29   :  { %s1351_s15 = scalar_lea.vmem %s50_s28, 4096  ;;  %p1356_p6 = scmp.lt.s32.totalorder %s50_s28, %s50_s28 }
  0x2a   :  { %p1352_p5 = scmp.ne.s32.totalorder %s50_s28, %s1351_s15  ;;  %p1357_p7 = scmp.lt.s32.totalorder %s1351_s15, %s1351_s15 }
  0x2c   :  { %p1358_p8 = por %p1357_p7, %p1356_p6 }
  0x2e   :  { %p1359_p9 = pnand %p1358_p8, %p1352_p5 }
  0x30   :  { %1362 = shalt.err (!%p1359_p9)
}
  0x31   :  { %s1372_s1 = smov 128   ;;  %s1373_s27 = smov 8  }
  0x32   :  { %55 = dma.hbm_to_vmem [thread:$0]  %s1510_s5, 4096, %s50_s28, [#allocation5], %s1372_s1, %s1372_s1, %s1373_s27  }
  0x33   :  { %1363 = dma.done.wait [#allocation3], 32768  }
  0x34   :  { %1364 = vsyncadd [#allocation3], 4294934528 }
  0x35   :  { %1365 = dma.done.wait [#allocation5], 12288  }
  0x36   :  { %1366 = vsyncadd [#allocation5], 4294955008  ;;  %v140_v0 = vld [vmem:[#allocation2 + $0x208] sm:$0xff]  ;;  %v142_v1 = vld [vmem:[#allocation2 + $0x218] sm:$0xff] }
  0x37   :  { %v139_v2 = vld [vmem:[#allocation2 + $0x200] sm:$0xff]  ;;  %v994_v3 = vpack.c.bf16 %v142_v1, %v140_v0  ;;  %v141_v4 = vld [vmem:[#allocation2 + $0x210] sm:$0xff]  ;;  %v144_v5 = vld [vmem:[#allocation2 + $0x228] sm:$0xff] }
  0x38   :  { %v146_v6 = vld [vmem:[#allocation2 + $0x238] sm:$0xff]  ;;  %v996_v7 = vpack.c.bf16 %v141_v4, %v139_v2  ;;  %v143_v9 = vld [vmem:[#allocation2 + $0x220] sm:$0xff]  ;;  %v145_v10 = vld [vmem:[#allocation2 + $0x230] sm:$0xff] }
  0x39   :  { %v998_v8 = vpack.c.bf16 %v146_v6, %v144_v5  ;;  %v148_v11 = vld [vmem:[#allocation2 + $0x248] sm:$0xff]  ;;  %995 = vmatprep.subr.bf16.mxu0 %v994_v3  ;;  %v150_v12 = vld [vmem:[#allocation2 + $0x258] sm:$0xff]  ;;  %v1000_v13 = vpack.c.bf16 %v145_v10, %v143_v9  ;;  %v147_v15 = vld [vmem:[#allocation2 + $0x240] sm:$0xff] }
  0x3a   :  { %997 = vmatpush1.bf16.msra.mxu0 %v996_v7  ;;  %v1002_v14 = vpack.c.bf16 %v150_v12, %v148_v11  ;;  %v149_v16 = vld [vmem:[#allocation2 + $0x250] sm:$0xff]  ;;  %v152_v17 = vld [vmem:[#allocation2 + $0x268] sm:$0xff]  ;;  %v154_v18 = vld [vmem:[#allocation2 + $0x278] sm:$0xff] }
  0x3b   :  { %999 = vmatprep.subr.bf16.mxu0 %v998_v8  ;;  %v1004_v19 = vpack.c.bf16 %v149_v16, %v147_v15  ;;  %v1006_v20 = vpack.c.bf16 %v154_v18, %v152_v17  ;;  %v151_v21 = vld [vmem:[#allocation2 + $0x260] sm:$0xff]  ;;  %v153_v22 = vld [vmem:[#allocation2 + $0x270] sm:$0xff]  ;;  %v156_v23 = vld [vmem:[#allocation2 + $0x288] sm:$0xff] }
  0x3c   :  { %v158_v24 = vld [vmem:[#allocation2 + $0x298] sm:$0xff]  ;;  %v1008_v25 = vpack.c.bf16 %v153_v22, %v151_v21  ;;  %v155_v27 = vld [vmem:[#allocation2 + $0x280] sm:$0xff]  ;;  %v157_v28 = vld [vmem:[#allocation2 + $0x290] sm:$0xff] }
  0x3d   :  { %v1010_v26 = vpack.c.bf16 %v158_v24, %v156_v23  ;;  %v160_v29 = vld [vmem:[#allocation2 + $0x2a8] sm:$0xff]  ;;  %v162_v30 = vld [vmem:[#allocation2 + $0x2b8] sm:$0xff]  ;;  %v1012_v31 = vpack.c.bf16 %v157_v28, %v155_v27  ;;  %v159_v33 = vld [vmem:[#allocation2 + $0x2a0] sm:$0xff] }
  0x3e   :  { %1001 = vmatpush1.bf16.msra.mxu0 %v1000_v13  ;;  %v1014_v32 = vpack.c.bf16 %v162_v30, %v160_v29  ;;  %v161_v34 = vld [vmem:[#allocation2 + $0x2b0] sm:$0xff]  ;;  %v164_v35 = vld [vmem:[#allocation2 + $0x2c8] sm:$0xff]  ;;  %v166_v36 = vld [vmem:[#allocation2 + $0x2d8] sm:$0xff] }
  0x3f   :  { %1003 = vmatprep.subr.bf16.mxu0 %v1002_v14  ;;  %v1016_v37 = vpack.c.bf16 %v161_v34, %v159_v33  ;;  %v1018_v38 = vpack.c.bf16 %v166_v36, %v164_v35  ;;  %v163_v39 = vld [vmem:[#allocation2 + $0x2c0] sm:$0xff]  ;;  %v165_v40 = vld [vmem:[#allocation2 + $0x2d0] sm:$0xff]  ;;  %v70_v41 = vld [vmem:[%s1505_s0 + $0x18] sm:$0xff] }
  0x40   :  { %v168_v42 = vld [vmem:[#allocation2 + $0x2e8] sm:$0xff]  ;;  %v170_v43 = vld [vmem:[#allocation2 + $0x2f8] sm:$0xff]  ;;  %478 = vmatprep.mubr.f32.mxu0 %v70_v41  ;;  %v1020_v44 = vpack.c.bf16 %v165_v40, %v163_v39  ;;  %v167_v46 = vld [vmem:[#allocation2 + $0x2e0] sm:$0xff] }
  0x41   :  { %v1022_v45 = vpack.c.bf16 %v170_v43, %v168_v42  ;;  %v169_v47 = vld [vmem:[#allocation2 + $0x2f0] sm:$0xff]  ;;  %v172_v48 = vld [vmem:[#allocation2 + $0x308] sm:$0xff]  ;;  %v174_v49 = vld [vmem:[#allocation2 + $0x318] sm:$0xff] }
  0x42   :  { %1005 = vmatpush1.bf16.msra.mxu0 %v1004_v19  ;;  %v1024_v50 = vpack.c.bf16 %v169_v47, %v167_v46  ;;  %v1026_v51 = vpack.c.bf16 %v174_v49, %v172_v48  ;;  %v171_v52 = vld [vmem:[#allocation2 + $0x300] sm:$0xff]  ;;  %v173_v53 = vld [vmem:[#allocation2 + $0x310] sm:$0xff]  ;;  %v176_v54 = vld [vmem:[#allocation2 + $0x328] sm:$0xff] }
  0x43   :  { %1007 = vmatprep.subr.bf16.mxu0 %v1006_v20  ;;  %v178_v55 = vld [vmem:[#allocation2 + $0x338] sm:$0xff]  ;;  %v1028_v56 = vpack.c.bf16 %v173_v53, %v171_v52  ;;  %v175_v58 = vld [vmem:[#allocation2 + $0x320] sm:$0xff]  ;;  %v177_v59 = vld [vmem:[#allocation2 + $0x330] sm:$0xff] }
  0x44   :  { %v1030_v57 = vpack.c.bf16 %v178_v55, %v176_v54  ;;  %v180_v60 = vld [vmem:[#allocation2 + $0x348] sm:$0xff]  ;;  %v182_v61 = vld [vmem:[#allocation2 + $0x358] sm:$0xff]  ;;  %v1032_v62 = vpack.c.bf16 %v177_v59, %v175_v58  ;;  %v179_v0 = vld [vmem:[#allocation2 + $0x340] sm:$0xff] }
  0x45   :  { %v1034_v63 = vpack.c.bf16 %v182_v61, %v180_v60  ;;  %v181_v1 = vld [vmem:[#allocation2 + $0x350] sm:$0xff]  ;;  %v184_v2 = vld [vmem:[#allocation2 + $0x368] sm:$0xff]  ;;  %v186_v3 = vld [vmem:[#allocation2 + $0x378] sm:$0xff] }
  0x46   :  { %1009 = vmatpush1.bf16.msra.mxu0 %v1008_v25  ;;  %v1036_v4 = vpack.c.bf16 %v181_v1, %v179_v0  ;;  %v1038_v5 = vpack.c.bf16 %v186_v3, %v184_v2  ;;  %v183_v6 = vld [vmem:[#allocation2 + $0x360] sm:$0xff]  ;;  %v185_v7 = vld [vmem:[#allocation2 + $0x370] sm:$0xff]  ;;  %v188_v8 = vld [vmem:[#allocation2 + $0x388] sm:$0xff] }
  0x47   :  { %1011 = vmatprep.subr.bf16.mxu0 %v1010_v26  ;;  %v190_v9 = vld [vmem:[#allocation2 + $0x398] sm:$0xff]  ;;  %v76_v10 = vld [vmem:[#allocation2 + $0x8] sm:$0xff]  ;;  %v1040_v12 = vpack.c.bf16 %v185_v7, %v183_v6  ;;  %v75_v14 = vld [vmem:[#allocation2] sm:$0xff] }
  0x48   :  { %v78_v11 = vld [vmem:[#allocation2 + $0x18] sm:$0xff]  ;;  %v77_v15 = vld [vmem:[#allocation2 + $0x10] sm:$0xff]  ;;  %v1042_v16 = vpack.c.bf16 %v190_v9, %v188_v8  ;;  %v187_v17 = vld [vmem:[#allocation2 + $0x380] sm:$0xff] }
  0x49   :  { %v930_v13 = vpack.c.bf16 %v78_v11, %v76_v10  ;;  %v189_v18 = vld [vmem:[#allocation2 + $0x390] sm:$0xff]  ;;  %v932_v19 = vpack.c.bf16 %v77_v15, %v75_v14  ;;  %v80_v20 = vld [vmem:[#allocation2 + $0x28] sm:$0xff]  ;;  %v194_v22 = vld [vmem:[#allocation2 + $0x3b8] sm:$0xff] }
  0x4a   :  { %1013 = vmatpush1.bf16.msra.mxu0 %v1012_v31  ;;  %v192_v21 = vld [vmem:[#allocation2 + $0x3a8] sm:$0xff]  ;;  %v82_v23 = vld [vmem:[#allocation2 + $0x38] sm:$0xff]  ;;  %v79_v25 = vld [vmem:[#allocation2 + $0x20] sm:$0xff]  ;;  %v1044_v27 = vpack.c.bf16 %v189_v18, %v187_v17 }
  0x4b   :  { %1015 = vmatprep.subr.bf16.mxu0 %v1014_v32  ;;  %931 = vmatprep.subr.bf16.mxu1 %v930_v13  ;;  %v934_v24 = vpack.c.bf16 %v82_v23, %v80_v20  ;;  %v81_v26 = vld [vmem:[#allocation2 + $0x30] sm:$0xff]  ;;  %v191_v28 = vld [vmem:[#allocation2 + $0x3a0] sm:$0xff]  ;;  %v84_v30 = vld [vmem:[#allocation2 + $0x48] sm:$0xff]  ;;  %v1046_v31 = vpack.c.bf16 %v194_v22, %v192_v21 }
  0x4c   :  { %933 = vmatpush1.bf16.msra.mxu1 %v932_v19  ;;  %v936_v29 = vpack.c.bf16 %v81_v26, %v79_v25  ;;  %v193_v32 = vld [vmem:[#allocation2 + $0x3b0] sm:$0xff]  ;;  %v196_v33 = vld [vmem:[#allocation2 + $0x3c8] sm:$0xff]  ;;  %v86_v34 = vld [vmem:[#allocation2 + $0x58] sm:$0xff] }
  0x4d   :  { %935 = vmatprep.subr.bf16.mxu1 %v934_v24  ;;  %v198_v35 = vld [vmem:[#allocation2 + $0x3d8] sm:$0xff]  ;;  %v938_v36 = vpack.c.bf16 %v86_v34, %v84_v30  ;;  %v88_v40 = vld [vmem:[#allocation2 + $0x68] sm:$0xff]  ;;  %v1048_v42 = vpack.c.bf16 %v193_v32, %v191_v28  ;;  %v195_v43 = vld [vmem:[#allocation2 + $0x3c0] sm:$0xff] }
  0x4e   :  { %1017 = vmatpush1.bf16.msra.mxu0 %v1016_v37  ;;  %v83_v37 = vld [vmem:[#allocation2 + $0x40] sm:$0xff]  ;;  %v90_v41 = vld [vmem:[#allocation2 + $0x78] sm:$0xff]  ;;  %v1050_v46 = vpack.c.bf16 %v198_v35, %v196_v33  ;;  %v197_v47 = vld [vmem:[#allocation2 + $0x3d0] sm:$0xff] }
  0x4f   :  { %1019 = vmatprep.subr.bf16.mxu0 %v1018_v38  ;;  %v85_v38 = vld [vmem:[#allocation2 + $0x50] sm:$0xff]  ;;  %v200_v48 = vld [vmem:[#allocation2 + $0x3e8] sm:$0xff]  ;;  %v94_v52 = vld [vmem:[#allocation2 + $0x98] sm:$0xff]  ;;  %v1052_v54 = vpack.c.bf16 %v197_v47, %v195_v43 }
  0x50   :  { %937 = vmatpush1.bf16.msra.mxu1 %v936_v29  ;;  %v940_v39 = vpack.c.bf16 %v85_v38, %v83_v37  ;;  %v89_v49 = vld [vmem:[#allocation2 + $0x70] sm:$0xff]  ;;  %v199_v55 = vld [vmem:[#allocation2 + $0x3e0] sm:$0xff]  ;;  %v96_v61 = vld [vmem:[#allocation2 + $0xa8] sm:$0xff] }
  0x51   :  { %939 = vmatprep.subr.bf16.mxu1 %v938_v36  ;;  %v93_v58 = vld [vmem:[#allocation2 + $0x90] sm:$0xff]  ;;  %v206_v0 = vld [vmem:[#allocation2 + $0x418] sm:$0xff]  ;;  %v203_v7 = vld [vmem:[#allocation2 + $0x400] sm:$0xff] }
  0x52   :  { %1021 = vmatpush1.bf16.msra.mxu0 %v1020_v44  ;;  %v942_v44 = vpack.c.bf16 %v90_v41, %v88_v40  ;;  %v201_v60 = vld [vmem:[#allocation2 + $0x3f0] sm:$0xff]  ;;  %v208_v9 = vld [vmem:[#allocation2 + $0x428] sm:$0xff]  ;;  %v210_v10 = vld [vmem:[#allocation2 + $0x438] sm:$0xff] }
  0x53   :  { %1023 = vmatprep.subr.bf16.mxu0 %v1022_v45  ;;  %v87_v45 = vld [vmem:[#allocation2 + $0x60] sm:$0xff]  ;;  %v1056_v2 = vpack.c.bf16 %v201_v60, %v199_v55  ;;  %v205_v8 = vld [vmem:[#allocation2 + $0x410] sm:$0xff]  ;;  %v100_v11 = vld [vmem:[#allocation2 + $0xc8] sm:$0xff]  ;;  %v1062_v20 = vpack.c.bf16 %v210_v10, %v208_v9 }
  0x54   :  { %941 = vmatpush1.bf16.msra.mxu1 %v940_v39  ;;  %v944_v53 = vpack.c.bf16 %v89_v49, %v87_v45  ;;  %v69_v13 = vld [vmem:[%s1505_s0 + $0x10] sm:$0xff]  ;;  %v207_v14 = vld [vmem:[#allocation2 + $0x420] sm:$0xff]  ;;  %v72_v21 = vld [vmem:[%s1505_s0 + $0x28] sm:$0xff] }
  0x55   :  { %943 = vmatprep.subr.bf16.mxu1 %v942_v44  ;;  %v209_v17 = vld [vmem:[#allocation2 + $0x430] sm:$0xff]  ;;  %v99_v18 = vld [vmem:[#allocation2 + $0xc0] sm:$0xff]  ;;  %v104_v23 = vld [vmem:[#allocation2 + $0xe8] sm:$0xff] }
  0x56   :  { %1025 = vmatpush1.bf16.msra.mxu0 %v1024_v50  ;;  %v202_v50 = vld [vmem:[#allocation2 + $0x3f8] sm:$0xff]  ;;  %v101_v19 = vld [vmem:[#allocation2 + $0xd0] sm:$0xff]  ;;  %v212_v25 = vld [vmem:[#allocation2 + $0x448] sm:$0xff]  ;;  %v1064_v28 = vpack.c.bf16 %v209_v17, %v207_v14 }
  0x57   :  { %1027 = vmatprep.subr.bf16.mxu0 %v1026_v51  ;;  %v92_v51 = vld [vmem:[#allocation2 + $0x88] sm:$0xff]  ;;  %v1054_v59 = vpack.c.bf16 %v202_v50, %v200_v48  ;;  %v106_v24 = vld [vmem:[#allocation2 + $0xf8] sm:$0xff]  ;;  %v211_v29 = vld [vmem:[#allocation2 + $0x440] sm:$0xff] }
  0x58   :  { %945 = vmatpush1.bf16.msra.mxu1 %v944_v53  ;;  %v214_v26 = vld [vmem:[#allocation2 + $0x458] sm:$0xff]  ;;  %v958_v30 = vpack.c.bf16 %v106_v24, %v104_v23  ;;  %v105_v32 = vld [vmem:[#allocation2 + $0xf0] sm:$0xff]  ;;  %v108_v35 = vld [vmem:[#allocation2 + $0x108] sm:$0xff] }
  0x59   :  { %v1066_v33 = vpack.c.bf16 %v214_v26, %v212_v25  ;;  %v213_v34 = vld [vmem:[#allocation2 + $0x450] sm:$0xff]  ;;  %v110_v36 = vld [vmem:[#allocation2 + $0x118] sm:$0xff]  ;;  %v216_v37 = vld [vmem:[#allocation2 + $0x468] sm:$0xff] }
  0x5a   :  { %1029 = vmatpush1.bf16.msra.mxu0 %v1028_v56  ;;  %v946_v56 = vpack.c.bf16 %v94_v52, %v92_v51  ;;  %v218_v38 = vld [vmem:[#allocation2 + $0x478] sm:$0xff]  ;;  %v1068_v40 = vpack.c.bf16 %v213_v34, %v211_v29  ;;  %v215_v41 = vld [vmem:[#allocation2 + $0x460] sm:$0xff]  ;;  %v109_v44 = vld [vmem:[#allocation2 + $0x110] sm:$0xff] }
  0x5b   :  { %1031 = vmatprep.subr.bf16.mxu0 %v1030_v57  ;;  %v91_v57 = vld [vmem:[#allocation2 + $0x80] sm:$0xff]  ;;  %v1070_v45 = vpack.c.bf16 %v218_v38, %v216_v37  ;;  %v112_v47 = vld [vmem:[#allocation2 + $0x128] sm:$0xff]  ;;  %v114_v48 = vld [vmem:[#allocation2 + $0x138] sm:$0xff] }
  0x5c   :  { %v948_v1 = vpack.c.bf16 %v93_v58, %v91_v57  ;;  %947 = vmatprep.subr.bf16.mxu1 %v946_v56  ;;  %v107_v43 = vld [vmem:[#allocation2 + $0x100] sm:$0xff]  ;;  %v220_v49 = vld [vmem:[#allocation2 + $0x488] sm:$0xff]  ;;  %v222_v50 = vld [vmem:[#allocation2 + $0x498] sm:$0xff] }
  0x5d   :  { %v964_v51 = vpack.c.bf16 %v109_v44, %v107_v43  ;;  %v219_v53 = vld [vmem:[#allocation2 + $0x480] sm:$0xff]  ;;  %v113_v56 = vld [vmem:[#allocation2 + $0x130] sm:$0xff]  ;;  %v1074_v57 = vpack.c.bf16 %v222_v50, %v220_v49  ;;  %v118_v60 = vld [vmem:[#allocation2 + $0x158] sm:$0xff] }
  0x5e   :  { %1033 = vmatpush1.bf16.msra.mxu0 %v1032_v62  ;;  %v98_v62 = vld [vmem:[#allocation2 + $0xb8] sm:$0xff]  ;;  %949 = vmatpush1.bf16.msra.mxu1 %v948_v1  ;;  %v111_v55 = vld [vmem:[#allocation2 + $0x120] sm:$0xff]  ;;  %v221_v58 = vld [vmem:[#allocation2 + $0x490] sm:$0xff] }
  0x5f   :  { %1035 = vmatprep.subr.bf16.mxu0 %v1034_v63  ;;  %v204_v63 = vld [vmem:[#allocation2 + $0x408] sm:$0xff]  ;;  %v950_v3 = vpack.c.bf16 %v98_v62, %v96_v61  ;;  %v226_v62 = vld [vmem:[#allocation2 + $0x4b8] sm:$0xff]  ;;  %v223_v1 = vld [vmem:[#allocation2 + $0x4a0] sm:$0xff] }
  0x60   :  { %v1058_v6 = vpack.c.bf16 %v206_v0, %v204_v63  ;;  %v224_v61 = vld [vmem:[#allocation2 + $0x4a8] sm:$0xff]  ;;  %v968_v63 = vpack.c.bf16 %v113_v56, %v111_v55  ;;  %v1076_v0 = vpack.c.bf16 %v221_v58, %v219_v53  ;;  %v230_v10 = vld [vmem:[#allocation2 + $0x4d8] sm:$0xff]  ;;  %v229_v14 = vld [vmem:[#allocation2 + $0x4d0] sm:$0xff] }
  0x61   :  { %951 = vmatprep.subr.bf16.mxu1 %v950_v3  ;;  %v115_v3 = vld [vmem:[#allocation2 + $0x140] sm:$0xff]  ;;  %v228_v9 = vld [vmem:[#allocation2 + $0x4c8] sm:$0xff]  ;;  %v121_v17 = vld [vmem:[#allocation2 + $0x170] sm:$0xff] }
  0x62   :  { %1037 = vmatpush1.bf16.msra.mxu0 %v1036_v4  ;;  %v95_v4 = vld [vmem:[#allocation2 + $0xa0] sm:$0xff]  ;;  %v234_v23 = vld [vmem:[#allocation2 + $0x4f8] sm:$0xff]  ;;  %v125_v29 = vld [vmem:[#allocation2 + $0x190] sm:$0xff] }
  0x63   :  { %1039 = vmatprep.subr.bf16.mxu0 %v1038_v5  ;;  %v97_v5 = vld [vmem:[#allocation2 + $0xb0] sm:$0xff]  ;;  %v231_v26 = vld [vmem:[#allocation2 + $0x4e0] sm:$0xff]  ;;  %v236_v34 = vld [vmem:[#allocation2 + $0x508] sm:$0xff] }
  0x64   :  { %v952_v15 = vpack.c.bf16 %v97_v5, %v95_v4  ;;  %v117_v4 = vld [vmem:[#allocation2 + $0x150] sm:$0xff]  ;;  %v1078_v5 = vpack.c.bf16 %v226_v62, %v224_v61  ;;  %v235_v38 = vld [vmem:[#allocation2 + $0x500] sm:$0xff]  ;;  %v132_v44 = vld [vmem:[#allocation2 + $0x1c8] sm:$0xff] }
  0x65   :  { %v237_v43 = vld [vmem:[#allocation2 + $0x510] sm:$0xff]  ;;  %v239_v50 = vld [vmem:[#allocation2 + $0x520] sm:$0xff]  ;;  %v136_v56 = vld [vmem:[#allocation2 + $0x1e8] sm:$0xff] }
  0x66   :  { %1041 = vmatpush1.bf16.msra.mxu0 %v1040_v12  ;;  %v102_v12 = vld [vmem:[#allocation2 + $0xd8] sm:$0xff]  ;;  %953 = vmatpush1.bf16.msra.mxu1 %v952_v15  ;;  %v1092_v49 = vpack.c.bf16 %v237_v43, %v235_v38  ;;  %v133_v53 = vld [vmem:[#allocation2 + $0x1d0] sm:$0xff]  ;;  %v244_v58 = vld [vmem:[#allocation2 + $0x548] sm:$0xff] }
  0x67   :  { %1043 = vmatprep.subr.bf16.mxu0 %v1042_v16  ;;  %v1060_v16 = vpack.c.bf16 %v205_v8, %v203_v7  ;;  %v954_v22 = vpack.c.bf16 %v102_v12, %v100_v11  ;;  %v120_v7 = vld [vmem:[#allocation2 + $0x168] sm:$0xff]  ;;  %v122_v8 = vld [vmem:[#allocation2 + $0x178] sm:$0xff]  ;;  %v227_v11 = vld [vmem:[#allocation2 + $0x4c0] sm:$0xff]  ;;  %v972_v12 = vpack.c.bf16 %v117_v4, %v115_v3 }
  0x68   :  { %v974_v15 = vpack.c.bf16 %v122_v8, %v120_v7  ;;  %v1084_v25 = vpack.c.bf16 %v229_v14, %v227_v11  ;;  %v241_v55 = vld [vmem:[#allocation2 + $0x530] sm:$0xff]  ;;  %v243_v62 = vld [vmem:[#allocation2 + $0x540] sm:$0xff]  ;;  %v630_v4 = vld [vmem:[#allocation4 + $0x8] sm:$0xff] }
  0x69   :  { %955 = vmatprep.subr.bf16.mxu1 %v954_v22  ;;  %v232_v22 = vld [vmem:[#allocation2 + $0x4e8] sm:$0xff]  ;;  %v1096_v61 = vpack.c.bf16 %v241_v55, %v239_v50  ;;  %v245_v3 = vld [vmem:[#allocation2 + $0x550] sm:$0xff]  ;;  %v250_v7 = vld [vmem:[#allocation2 + $0x578] sm:$0xff] }
  0x6a   :  { %1045 = vmatpush1.bf16.msra.mxu0 %v1044_v27  ;;  %v956_v27 = vpack.c.bf16 %v101_v19, %v99_v18  ;;  %v1082_v18 = vpack.c.bf16 %v230_v10, %v228_v9  ;;  %v124_v19 = vld [vmem:[#allocation2 + $0x188] sm:$0xff]  ;;  %v1100_v9 = vpack.c.bf16 %v245_v3, %v243_v62  ;;  %v247_v10 = vld [vmem:[#allocation2 + $0x560] sm:$0xff]  ;;  %v639_v38 = vld [vmem:[#allocation4 + $0x50] sm:$0xff] }
  0x6b   :  { %1047 = vmatprep.subr.bf16.mxu0 %v1046_v31  ;;  %v103_v31 = vld [vmem:[#allocation2 + $0xe0] sm:$0xff]  ;;  %v260_v43 = vld [vmem:[#allocation2 + $0x5c8] sm:$0xff]  ;;  %v643_v50 = vld [vmem:[#allocation4 + $0x70] sm:$0xff] }
  0x6c   :  { %957 = vmatpush1.bf16.msra.mxu1 %v956_v27  ;;  %v960_v39 = vpack.c.bf16 %v105_v32, %v103_v31  ;;  %v233_v31 = vld [vmem:[#allocation2 + $0x4f0] sm:$0xff]  ;;  %v128_v32 = vld [vmem:[#allocation2 + $0x1a8] sm:$0xff] }
  0x6d   :  { %959 = vmatprep.subr.bf16.mxu1 %v958_v30  ;;  %v1086_v30 = vpack.c.bf16 %v234_v23, %v232_v22  ;;  %v1088_v37 = vpack.c.bf16 %v233_v31, %v231_v26  ;;  %v251_v23 = vld [vmem:[#allocation2 + $0x580] sm:$0xff]  ;;  %v635_v26 = vld [vmem:[#allocation4 + $0x30] sm:$0xff]  ;;  %v256_v31 = vld [vmem:[#allocation2 + $0x5a8] sm:$0xff] }
  0x6e   :  { %1049 = vmatpush1.bf16.msra.mxu0 %v1048_v42  ;;  %v962_v42 = vpack.c.bf16 %v110_v36, %v108_v35  ;;  %v238_v35 = vld [vmem:[#allocation2 + $0x518] sm:$0xff]  ;;  %v264_v55 = vld [vmem:[#allocation2 + $0x5e8] sm:$0xff]  ;;  %v647_v62 = vld [vmem:[#allocation4 + $0x90] sm:$0xff] }
  0x6f   :  { %1051 = vmatprep.subr.bf16.mxu0 %v1050_v46  ;;  %v217_v46 = vld [vmem:[#allocation2 + $0x470] sm:$0xff]  ;;  %v268_v3 = vld [vmem:[#allocation2 + $0x608] sm:$0xff] }
  0x70   :  { %961 = vmatpush1.bf16.msra.mxu1 %v960_v39  ;;  %v1072_v52 = vpack.c.bf16 %v217_v46, %v215_v41  ;;  %v129_v41 = vld [vmem:[#allocation2 + $0x1b0] sm:$0xff]  ;;  %v240_v46 = vld [vmem:[#allocation2 + $0x528] sm:$0xff] }
  0x71   :  { %963 = vmatprep.subr.bf16.mxu1 %v962_v42  ;;  %v1090_v42 = vpack.c.bf16 %v238_v35, %v236_v34  ;;  %v255_v35 = vld [vmem:[#allocation2 + $0x5a0] sm:$0xff] }
  0x72   :  { %1053 = vmatpush1.bf16.msra.mxu0 %v1052_v54  ;;  %v966_v54 = vpack.c.bf16 %v114_v48, %v112_v47  ;;  %v242_v47 = vld [vmem:[#allocation2 + $0x538] sm:$0xff] }
  0x73   :  { %1055 = vmatprep.subr.bf16.mxu0 %v1054_v59  ;;  %v116_v59 = vld [vmem:[#allocation2 + $0x148] sm:$0xff] }
  0x74   :  { %965 = vmatpush1.bf16.msra.mxu1 %v964_v51 }
  0x75   :  { %967 = vmatprep.subr.bf16.mxu1 %v966_v54  ;;  %v1094_v54 = vpack.c.bf16 %v242_v47, %v240_v46  ;;  %v259_v47 = vld [vmem:[#allocation2 + $0x5c0] sm:$0xff] }
  0x76   :  { %1057 = vmatpush1.bf16.msra.mxu0 %v1056_v2  ;;  %v970_v2 = vpack.c.bf16 %v118_v60, %v116_v59  ;;  %v246_v59 = vld [vmem:[#allocation2 + $0x558] sm:$0xff] }
  0x77   :  { %1059 = vmatprep.subr.bf16.mxu0 %v1058_v6  ;;  %v225_v6 = vld [vmem:[#allocation2 + $0x4b0] sm:$0xff] }
  0x78   :  { %969 = vmatpush1.bf16.msra.mxu1 %v968_v63 }
  0x79   :  { %479 = vmatmul.mubr.f32.vlgmr.msra.gmra.mrb[0].mxu0 %v69_v13  ;;  %v1080_v13 = vpack.c.bf16 %v225_v6, %v223_v1  ;;  %971 = vmatprep.subr.bf16.mxu1 %v970_v2  ;;  %v137_v1 = vld [vmem:[#allocation2 + $0x1f0] sm:$0xff]  ;;  %v1098_v2 = vpack.c.bf16 %v246_v59, %v244_v58  ;;  %v248_v6 = vld [vmem:[#allocation2 + $0x568] sm:$0xff]  ;;  %v263_v59 = vld [vmem:[#allocation2 + $0x5e0] sm:$0xff] }
  0x7a   :  { %1061 = vmatpush1.bf16.msra.mxu0 %v1060_v16  ;;  %549 = vmatprep.mubr.f32.mxu0 %v72_v21  ;;  %v119_v16 = vld [vmem:[#allocation2 + $0x160] sm:$0xff]  ;;  %v68_v21 = vld [vmem:[%s1505_s0 + $0x8] sm:$0xff]  ;;  %v1102_v14 = vpack.c.bf16 %v250_v7, %v248_v6 }
  0x7b   :  { %1063 = vmatprep.subr.bf16.mxu0 %v1062_v20  ;;  %v126_v20 = vld [vmem:[#allocation2 + $0x198] sm:$0xff]  ;;  %407 = vmatprep.mubr.f32.mxu1 %v68_v21  ;;  %v976_v24 = vpack.c.bf16 %v121_v17, %v119_v16  ;;  %v634_v16 = vld [vmem:[#allocation4 + $0x28] sm:$0xff] }
  0x7c   :  { %973 = vmatpush1.bf16.msra.mxu1 %v972_v12  ;;  %v978_v27 = vpack.c.bf16 %v126_v20, %v124_v19  ;;  %v629_v12 = vld [vmem:[#allocation4] sm:$0xff]  ;;  %v636_v17 = vld [vmem:[#allocation4 + $0x38] sm:$0xff] }
  0x7d   :  { %975 = vmatprep.subr.bf16.mxu1 %v974_v15  ;;  %v249_v15 = vld [vmem:[#allocation2 + $0x570] sm:$0xff]  ;;  %v254_v19 = vld [vmem:[#allocation2 + $0x598] sm:$0xff]  ;;  %v67_v20 = vld [vmem:[%s1505_s0] sm:$0xff] }
  0x7e   :  { %1065 = vmatpush1.bf16.msra.mxu0 %v1064_v28  ;;  %v123_v28 = vld [vmem:[#allocation2 + $0x180] sm:$0xff]  ;;  %v1104_v22 = vpack.c.bf16 %v249_v15, %v247_v10  ;;  %v654_v15 = vld [vmem:[#allocation4 + $0xc8] sm:$0xff] }
  0x7f   :  { %1067 = vmatprep.subr.bf16.mxu0 %v1066_v33  ;;  %v130_v33 = vld [vmem:[#allocation2 + $0x1b8] sm:$0xff]  ;;  %v980_v36 = vpack.c.bf16 %v125_v29, %v123_v28  ;;  %v253_v28 = vld [vmem:[#allocation2 + $0x590] sm:$0xff]  ;;  %v638_v29 = vld [vmem:[#allocation4 + $0x48] sm:$0xff] }
  0x80   :  { %977 = vmatpush1.bf16.msra.mxu1 %v976_v24  ;;  %v982_v39 = vpack.c.bf16 %v130_v33, %v128_v32  ;;  %v1190_v24 = vpack.c.bf16 %v636_v17, %v634_v16  ;;  %v258_v32 = vld [vmem:[#allocation2 + $0x5b8] sm:$0xff]  ;;  %v1108_v34 = vpack.c.bf16 %v253_v28, %v251_v23  ;;  %v71_v17 = vld [vmem:[%s1505_s0 + $0x20] sm:$0xff]  ;;  %v655_v23 = vld [vmem:[#allocation4 + $0xd0] sm:$0xff] }
  0x81   :  { %979 = vmatprep.subr.bf16.mxu1 %v978_v27  ;;  %v656_v16 = vld [vmem:[#allocation4 + $0xd8] sm:$0xff] }
  0x82   :  { %1069 = vmatpush1.bf16.msra.mxu0 %v1068_v40  ;;  %v127_v40 = vld [vmem:[#allocation2 + $0x1a0] sm:$0xff]  ;;  %v660_v28 = vld [vmem:[#allocation4 + $0xf8] sm:$0xff] }
  0x83   :  { %1071 = vmatprep.subr.bf16.mxu0 %v1070_v45  ;;  %v134_v45 = vld [vmem:[#allocation2 + $0x1d8] sm:$0xff]  ;;  %v984_v48 = vpack.c.bf16 %v129_v41, %v127_v40  ;;  %v257_v40 = vld [vmem:[#allocation2 + $0x5b0] sm:$0xff]  ;;  %v642_v41 = vld [vmem:[#allocation4 + $0x68] sm:$0xff] }
  0x84   :  { %981 = vmatpush1.bf16.msra.mxu1 %v980_v36  ;;  %v986_v51 = vpack.c.bf16 %v134_v45, %v132_v44  ;;  %v262_v44 = vld [vmem:[#allocation2 + $0x5d8] sm:$0xff]  ;;  %v1112_v46 = vpack.c.bf16 %v257_v40, %v255_v35  ;;  %v657_v35 = vld [vmem:[#allocation4 + $0xe0] sm:$0xff] }
  0x85   :  { %983 = vmatprep.subr.bf16.mxu1 %v982_v39  ;;  %v1110_v39 = vpack.c.bf16 %v258_v32, %v256_v31  ;;  %v664_v40 = vld [vmem:[#allocation4 + $0x118] sm:$0xff] }
  0x86   :  { %1073 = vmatpush1.bf16.msra.mxu0 %v1072_v52  ;;  %v131_v52 = vld [vmem:[#allocation2 + $0x1c0] sm:$0xff] }
  0x87   :  { %1075 = vmatprep.subr.bf16.mxu0 %v1074_v57  ;;  %v138_v57 = vld [vmem:[#allocation2 + $0x1f8] sm:$0xff]  ;;  %v988_v60 = vpack.c.bf16 %v133_v53, %v131_v52  ;;  %v261_v52 = vld [vmem:[#allocation2 + $0x5d0] sm:$0xff]  ;;  %v646_v53 = vld [vmem:[#allocation4 + $0x88] sm:$0xff] }
  0x88   :  { %985 = vmatpush1.bf16.msra.mxu1 %v984_v48  ;;  %v990_v63 = vpack.c.bf16 %v138_v57, %v136_v56  ;;  %v266_v56 = vld [vmem:[#allocation2 + $0x5f8] sm:$0xff]  ;;  %v1116_v58 = vpack.c.bf16 %v261_v52, %v259_v47  ;;  %v661_v47 = vld [vmem:[#allocation4 + $0x100] sm:$0xff] }
  0x89   :  { %987 = vmatprep.subr.bf16.mxu1 %v986_v51  ;;  %v1114_v51 = vpack.c.bf16 %v262_v44, %v260_v43  ;;  %v668_v52 = vld [vmem:[#allocation4 + $0x138] sm:$0xff] }
  0x8a   :  { %1077 = vmatpush1.bf16.msra.mxu0 %v1076_v0  ;;  %v135_v0 = vld [vmem:[#allocation2 + $0x1e0] sm:$0xff] }
  0x8b   :  { %1079 = vmatprep.subr.bf16.mxu0 %v1078_v5  ;;  %v632_v5 = vld [vmem:[#allocation4 + $0x18] sm:$0xff]  ;;  %v992_v8 = vpack.c.bf16 %v137_v1, %v135_v0  ;;  %v265_v0 = vld [vmem:[#allocation2 + $0x5f0] sm:$0xff]  ;;  %v650_v1 = vld [vmem:[#allocation4 + $0xa8] sm:$0xff] }
  0x8c   :  { %989 = vmatpush1.bf16.msra.mxu1 %v988_v60  ;;  %v1186_v11 = vpack.c.bf16 %v632_v5, %v630_v4  ;;  %v270_v4 = vld [vmem:[#allocation2 + $0x618] sm:$0xff]  ;;  %v1120_v6 = vpack.c.bf16 %v265_v0, %v263_v59  ;;  %v665_v59 = vld [vmem:[#allocation4 + $0x120] sm:$0xff] }
  0x8d   :  { %991 = vmatprep.subr.bf16.mxu1 %v990_v63  ;;  %v1118_v63 = vpack.c.bf16 %v266_v56, %v264_v55  ;;  %v1122_v10 = vpack.c.bf16 %v270_v4, %v268_v3  ;;  %v672_v0 = vld [vmem:[#allocation4 + $0x158] sm:$0xff] }
  0x8e   :  { %1081 = vmatpush1.bf16.msra.mxu0 %v1080_v13  ;;  %v631_v13 = vld [vmem:[#allocation4 + $0x10] sm:$0xff] }
  0x8f   :  { %1083 = vmatprep.subr.bf16.mxu0 %v1082_v18  ;;  %v252_v18 = vld [vmem:[#allocation2 + $0x588] sm:$0xff]  ;;  %v1188_v21 = vpack.c.bf16 %v631_v13, %v629_v12  ;;  %v269_v12 = vld [vmem:[#allocation2 + $0x610] sm:$0xff] }
  0x90   :  { %993 = vmatpush1.bf16.msra.mxu1 %v992_v8  ;;  %v1106_v27 = vpack.c.bf16 %v254_v19, %v252_v18  ;;  %v649_v8 = vld [vmem:[#allocation4 + $0xa0] sm:$0xff]  ;;  %v272_v13 = vld [vmem:[#allocation2 + $0x628] sm:$0xff] }
  0x91   :  { %1187 = vmatprep.subr.bf16.mxu1 %v1186_v11  ;;  %v267_v11 = vld [vmem:[#allocation2 + $0x600] sm:$0xff] }
  0x92   :  { %1085 = vmatpush1.bf16.msra.mxu0 %v1084_v25  ;;  %v633_v25 = vld [vmem:[#allocation4 + $0x20] sm:$0xff] }
  0x93   :  { %1087 = vmatprep.subr.bf16.mxu0 %v1086_v30  ;;  %v640_v30 = vld [vmem:[#allocation4 + $0x58] sm:$0xff]  ;;  %408 = vmatmul.mubr.f32.vlgmr.msra.gmra.mrb[0].mxu1 %v67_v20  ;;  %v1192_v33 = vpack.c.bf16 %v635_v26, %v633_v25  ;;  %v271_v18 = vld [vmem:[#allocation2 + $0x620] sm:$0xff]  ;;  %v1124_v20 = vpack.c.bf16 %v269_v12, %v267_v11  ;;  %v1210_v26 = vpack.c.bf16 %v656_v16, %v654_v15  ;;  %v674_v11 = vld [vmem:[#allocation4 + $0x168] sm:$0xff] }
  0x94   :  { %1189 = vmatpush1.bf16.msra.mxu1 %v1188_v21  ;;  %v1194_v36 = vpack.c.bf16 %v640_v30, %v638_v29  ;;  %v273_v21 = vld [vmem:[#allocation2 + $0x630] sm:$0xff]  ;;  %v74_v25 = vld [vmem:[%s1505_s0 + $0x38] sm:$0xff]  ;;  %v276_v29 = vld [vmem:[#allocation2 + $0x648] sm:$0xff] }
  0x95   :  { %1191 = vmatprep.subr.bf16.mxu1 %v1190_v24  ;;  %v278_v30 = vld [vmem:[#allocation2 + $0x658] sm:$0xff]  ;;  %v1128_v32 = vpack.c.bf16 %v273_v21, %v271_v18 }
  0x96   :  { %1089 = vmatpush1.bf16.msra.mxu0 %v1088_v37  ;;  %v637_v37 = vld [vmem:[#allocation4 + $0x40] sm:$0xff]  ;;  %v676_v12 = vld [vmem:[#allocation4 + $0x178] sm:$0xff] }
  0x97   :  { %1091 = vmatprep.subr.bf16.mxu0 %v1090_v42  ;;  %v644_v42 = vld [vmem:[#allocation4 + $0x78] sm:$0xff]  ;;  %v1196_v45 = vpack.c.bf16 %v639_v38, %v637_v37  ;;  %v1130_v37 = vpack.c.bf16 %v278_v30, %v276_v29  ;;  %v277_v38 = vld [vmem:[#allocation2 + $0x650] sm:$0xff]  ;;  %v1230_v18 = vpack.c.bf16 %v676_v12, %v674_v11  ;;  %v295_v29 = vld [vmem:[#allocation2 + $0x6e0] sm:$0xff] }
  0x98   :  { %1193 = vmatpush1.bf16.msra.mxu1 %v1192_v33  ;;  %v1198_v48 = vpack.c.bf16 %v644_v42, %v642_v41  ;;  %v275_v33 = vld [vmem:[#allocation2 + $0x640] sm:$0xff]  ;;  %v280_v41 = vld [vmem:[#allocation2 + $0x668] sm:$0xff]  ;;  %v282_v42 = vld [vmem:[#allocation2 + $0x678] sm:$0xff] }
  0x99   :  { %1195 = vmatprep.subr.bf16.mxu1 %v1194_v36  ;;  %v659_v36 = vld [vmem:[#allocation4 + $0xf0] sm:$0xff]  ;;  %v1132_v44 = vpack.c.bf16 %v277_v38, %v275_v33  ;;  %v302_v38 = vld [vmem:[#allocation2 + $0x718] sm:$0xff]  ;;  %v319_v12 = vld [vmem:[#allocation2 + $0x7a0] sm:$0xff] }
  0x9a   :  { %1093 = vmatpush1.bf16.msra.mxu0 %v1092_v49  ;;  %v641_v49 = vld [vmem:[#allocation4 + $0x60] sm:$0xff]  ;;  %v1216_v43 = vpack.c.bf16 %v659_v36, %v657_v35  ;;  %v682_v35 = vld [vmem:[#allocation4 + $0x1a8] sm:$0xff]  ;;  %v684_v36 = vld [vmem:[#allocation4 + $0x1b8] sm:$0xff] }
  0x9b   :  { %1095 = vmatprep.subr.bf16.mxu0 %v1094_v54  ;;  %v648_v54 = vld [vmem:[#allocation4 + $0x98] sm:$0xff]  ;;  %v1200_v57 = vpack.c.bf16 %v643_v50, %v641_v49  ;;  %v1134_v49 = vpack.c.bf16 %v282_v42, %v280_v41  ;;  %v281_v50 = vld [vmem:[#allocation2 + $0x670] sm:$0xff]  ;;  %v1238_v41 = vpack.c.bf16 %v684_v36, %v682_v35  ;;  %v681_v42 = vld [vmem:[#allocation4 + $0x1a0] sm:$0xff] }
  0x9c   :  { %1197 = vmatpush1.bf16.msra.mxu1 %v1196_v45  ;;  %v1202_v60 = vpack.c.bf16 %v648_v54, %v646_v53  ;;  %v279_v45 = vld [vmem:[#allocation2 + $0x660] sm:$0xff]  ;;  %v284_v53 = vld [vmem:[#allocation2 + $0x688] sm:$0xff]  ;;  %v286_v54 = vld [vmem:[#allocation2 + $0x698] sm:$0xff] }
  0x9d   :  { %1199 = vmatprep.subr.bf16.mxu1 %v1198_v48  ;;  %v663_v48 = vld [vmem:[#allocation4 + $0x110] sm:$0xff]  ;;  %v1136_v56 = vpack.c.bf16 %v281_v50, %v279_v45  ;;  %v299_v45 = vld [vmem:[#allocation2 + $0x700] sm:$0xff]  ;;  %v692_v35 = vld [vmem:[#allocation4 + $0x1f8] sm:$0xff] }
  0x9e   :  { %1097 = vmatpush1.bf16.msra.mxu0 %v1096_v61  ;;  %v645_v61 = vld [vmem:[#allocation4 + $0x80] sm:$0xff]  ;;  %v1220_v55 = vpack.c.bf16 %v663_v48, %v661_v47  ;;  %v304_v47 = vld [vmem:[#allocation2 + $0x728] sm:$0xff]  ;;  %v306_v48 = vld [vmem:[#allocation2 + $0x738] sm:$0xff] }
  0x9f   :  { %1099 = vmatprep.subr.bf16.mxu0 %v1098_v2  ;;  %v652_v2 = vld [vmem:[#allocation4 + $0xb8] sm:$0xff]  ;;  %v1204_v5 = vpack.c.bf16 %v647_v62, %v645_v61  ;;  %v1138_v61 = vpack.c.bf16 %v286_v54, %v284_v53  ;;  %v285_v62 = vld [vmem:[#allocation2 + $0x690] sm:$0xff]  ;;  %v308_v54 = vld [vmem:[#allocation2 + $0x748] sm:$0xff] }
  0xa0   :  { %1201 = vmatpush1.bf16.msra.mxu1 %v1200_v57  ;;  %v1206_v7 = vpack.c.bf16 %v652_v2, %v650_v1  ;;  %v283_v57 = vld [vmem:[#allocation2 + $0x680] sm:$0xff]  ;;  %v288_v1 = vld [vmem:[#allocation2 + $0x6a8] sm:$0xff]  ;;  %v290_v2 = vld [vmem:[#allocation2 + $0x6b8] sm:$0xff] }
  0xa1   :  { %1203 = vmatprep.subr.bf16.mxu1 %v1202_v60  ;;  %v667_v60 = vld [vmem:[#allocation4 + $0x130] sm:$0xff]  ;;  %v1140_v4 = vpack.c.bf16 %v285_v62, %v283_v57 }
  0xa2   :  { %1101 = vmatpush1.bf16.msra.mxu0 %v1100_v9  ;;  %v651_v9 = vld [vmem:[#allocation4 + $0xb0] sm:$0xff]  ;;  %v1224_v3 = vpack.c.bf16 %v667_v60, %v665_v59  ;;  %v312_v60 = vld [vmem:[#allocation2 + $0x768] sm:$0xff] }
  0xa3   :  { %1103 = vmatprep.subr.bf16.mxu0 %v1102_v14  ;;  %v274_v14 = vld [vmem:[#allocation2 + $0x638] sm:$0xff]  ;;  %v1208_v19 = vpack.c.bf16 %v651_v9, %v649_v8  ;;  %v671_v8 = vld [vmem:[#allocation4 + $0x150] sm:$0xff]  ;;  %v1142_v9 = vpack.c.bf16 %v290_v2, %v288_v1  ;;  %v316_v2 = vld [vmem:[#allocation2 + $0x788] sm:$0xff] }
  0xa4   :  { %1205 = vmatpush1.bf16.msra.mxu1 %v1204_v5  ;;  %v1126_v24 = vpack.c.bf16 %v274_v14, %v272_v13  ;;  %v287_v5 = vld [vmem:[#allocation2 + $0x6a0] sm:$0xff]  ;;  %v292_v13 = vld [vmem:[#allocation2 + $0x6c8] sm:$0xff]  ;;  %v294_v14 = vld [vmem:[#allocation2 + $0x6d8] sm:$0xff] }
  0xa5   :  { %1207 = vmatprep.subr.bf16.mxu1 %v1206_v7  ;;  %v669_v7 = vld [vmem:[#allocation4 + $0x140] sm:$0xff]  ;;  %v1146_v21 = vpack.c.bf16 %v294_v14, %v292_v13  ;;  %v305_v53 = vld [vmem:[#allocation2 + $0x730] sm:$0xff]  ;;  %v324_v14 = vld [vmem:[#allocation2 + $0x7c8] sm:$0xff] }
  0xa6   :  { %1105 = vmatpush1.bf16.msra.mxu0 %v1104_v22  ;;  %v653_v22 = vld [vmem:[#allocation4 + $0xc0] sm:$0xff]  ;;  %v1228_v15 = vpack.c.bf16 %v671_v8, %v669_v7  ;;  %v309_v59 = vld [vmem:[#allocation2 + $0x750] sm:$0xff]  ;;  %v320_v8 = vld [vmem:[#allocation2 + $0x7a8] sm:$0xff] }
  0xa7   :  { %1107 = vmatprep.subr.bf16.mxu0 %v1106_v27  ;;  %v658_v27 = vld [vmem:[#allocation4 + $0xe8] sm:$0xff]  ;;  %v1212_v31 = vpack.c.bf16 %v655_v23, %v653_v22  ;;  %v293_v22 = vld [vmem:[#allocation2 + $0x6d0] sm:$0xff] }
  0xa8   :  { %1209 = vmatpush1.bf16.msra.mxu1 %v1208_v19  ;;  %v673_v19 = vld [vmem:[#allocation4 + $0x160] sm:$0xff]  ;;  %v678_v23 = vld [vmem:[#allocation4 + $0x188] sm:$0xff]  ;;  %v313_v1 = vld [vmem:[#allocation2 + $0x770] sm:$0xff] }
  0xa9   :  { %1211 = vmatprep.subr.bf16.mxu1 %v1210_v26  ;;  %v298_v26 = vld [vmem:[#allocation2 + $0x6f8] sm:$0xff]  ;;  %v317_v7 = vld [vmem:[#allocation2 + $0x790] sm:$0xff] }
  0xaa   :  { %1109 = vmatpush1.bf16.msra.mxu0 %v1108_v34  ;;  %v1214_v34 = vpack.c.bf16 %v660_v28, %v658_v27  ;;  %v321_v13 = vld [vmem:[#allocation2 + $0x7b0] sm:$0xff] }
  0xab   :  { %1111 = vmatprep.subr.bf16.mxu0 %v1110_v39  ;;  %v662_v39 = vld [vmem:[#allocation4 + $0x108] sm:$0xff] }
  0xac   :  { %1213 = vmatpush1.bf16.msra.mxu1 %v1212_v31  ;;  %v677_v31 = vld [vmem:[#allocation4 + $0x180] sm:$0xff] }
  0xad   :  { %1215 = vmatprep.subr.bf16.mxu1 %v1214_v34  ;;  %v297_v34 = vld [vmem:[#allocation2 + $0x6f0] sm:$0xff] }
  0xae   :  { %1113 = vmatpush1.bf16.msra.mxu0 %v1112_v46  ;;  %v1218_v46 = vpack.c.bf16 %v664_v40, %v662_v39  ;;  %v1152_v40 = vpack.c.bf16 %v297_v34, %v295_v29  ;;  %v688_v29 = vld [vmem:[#allocation4 + $0x1d8] sm:$0xff]  ;;  %v690_v34 = vld [vmem:[#allocation4 + $0x1e8] sm:$0xff] }
  0xaf   :  { %1115 = vmatprep.subr.bf16.mxu0 %v1114_v51  ;;  %v666_v51 = vld [vmem:[#allocation4 + $0x128] sm:$0xff]  ;;  %v1246_v36 = vpack.c.bf16 %v692_v35, %v690_v34  ;;  %v808_v35 = vld [vmem:[#allocation6 + $0xf0] sm:$0xff] }
  0xb0   :  { %1217 = vmatpush1.bf16.msra.mxu1 %v1216_v43  ;;  %v683_v43 = vld [vmem:[#allocation4 + $0x1b0] sm:$0xff] }
  0xb1   :  { %1219 = vmatprep.subr.bf16.mxu1 %v1218_v46  ;;  %v301_v46 = vld [vmem:[#allocation2 + $0x710] sm:$0xff] }
  0xb2   :  { %1117 = vmatpush1.bf16.msra.mxu0 %v1116_v58  ;;  %v1222_v58 = vpack.c.bf16 %v668_v52, %v666_v51  ;;  %v1156_v50 = vpack.c.bf16 %v301_v46, %v299_v45  ;;  %v1158_v51 = vpack.c.bf16 %v306_v48, %v304_v47  ;;  %v303_v52 = vld [vmem:[#allocation2 + $0x720] sm:$0xff]  ;;  %v333_v45 = vlaneseq }
  0xb3   :  { %1119 = vmatprep.subr.bf16.mxu0 %v1118_v63  ;;  %v670_v63 = vld [vmem:[#allocation4 + $0x148] sm:$0xff]  ;;  %v331_v48 = vld [vmem:[%s1507_s2] sm:$0x3] }
  0xb4   :  { %1221 = vmatpush1.bf16.msra.mxu1 %v1220_v55  ;;  %v310_v55 = vld [vmem:[#allocation2 + $0x758] sm:$0xff]  ;;  %v1481_v46 = vshrl.u32 %v333_v45, 7 }
  0xb5   :  { %1223 = vmatprep.subr.bf16.mxu1 %v1222_v58  ;;  %v1162_v57 = vpack.c.bf16 %v310_v55, %v308_v54  ;;  %v307_v58 = vld [vmem:[#allocation2 + $0x740] sm:$0xff] }
  0xb6   :  { %1121 = vmatpush1.bf16.msra.mxu0 %v1120_v6  ;;  %v1226_v6 = vpack.c.bf16 %v672_v0, %v670_v63  ;;  %v1164_v62 = vpack.c.bf16 %v309_v59, %v307_v58  ;;  %v311_v0 = vld [vmem:[#allocation2 + $0x760] sm:$0xff]  ;;  %v335_v47 = vsub.s32 0, %v1481_v46  ;;  %v779_v58 = vld [vmem:[#allocation6 + $0x8] sm:$0xff] }
  0xb7   :  { %1123 = vmatprep.subr.bf16.mxu0 %v1122_v10  ;;  %v289_v10 = vld [vmem:[#allocation2 + $0x6b0] sm:$0xff] }
  0xb8   :  { %1225 = vmatpush1.bf16.msra.mxu1 %v1224_v3  ;;  %v1144_v16 = vpack.c.bf16 %v289_v10, %v287_v5  ;;  %v318_v3 = vld [vmem:[#allocation2 + $0x798] sm:$0xff] }
  0xb9   :  { %550 = vmatmul.mubr.f32.vlgmr.msra.gmra.mrb[0].mxu0 %v71_v17  ;;  %v291_v17 = vld [vmem:[#allocation2 + $0x6c0] sm:$0xff]  ;;  %1227 = vmatprep.subr.bf16.mxu1 %v1226_v6  ;;  %v1170_v5 = vpack.c.bf16 %v318_v3, %v316_v2  ;;  %v780_v2 = vld [vmem:[#allocation6 + $0x10] sm:$0xff]  ;;  %v781_v3 = vld [vmem:[#allocation6 + $0x18] sm:$0xff] }
  0xba   :  { %1125 = vmatpush1.bf16.msra.mxu0 %v1124_v20  ;;  %620 = vmatprep.mubr.f32.mxu0 %v74_v25  ;;  %v675_v20 = vld [vmem:[#allocation4 + $0x170] sm:$0xff]  ;;  %v296_v25 = vld [vmem:[#allocation2 + $0x6e8] sm:$0xff]  ;;  %v1148_v28 = vpack.c.bf16 %v293_v22, %v291_v17  ;;  %v315_v6 = vld [vmem:[#allocation2 + $0x780] sm:$0xff] }
  0xbb   :  { %1127 = vmatprep.subr.bf16.mxu0 %v1126_v24  ;;  %v680_v24 = vld [vmem:[#allocation4 + $0x198] sm:$0xff]  ;;  %v1232_v27 = vpack.c.bf16 %v675_v20, %v673_v19  ;;  %v1150_v33 = vpack.c.bf16 %v298_v26, %v296_v25  ;;  %v1172_v10 = vpack.c.bf16 %v317_v7, %v315_v6  ;;  %v325_v19 = vld [vmem:[#allocation2 + $0x7d0] sm:$0xff]  ;;  %v328_v20 = vld [vmem:[#allocation2 + $0x7e8] sm:$0xff]  ;;  %v1256_v6 = vpack.c.bf16 %v781_v3, %v780_v2 }
  0xbc   :  { %1229 = vmatpush1.bf16.msra.mxu1 %v1228_v15  ;;  %v1234_v30 = vpack.c.bf16 %v680_v24, %v678_v23  ;;  %v326_v15 = vld [vmem:[#allocation2 + $0x7d8] sm:$0xff]  ;;  %v327_v24 = vld [vmem:[#allocation2 + $0x7e0] sm:$0xff]  ;;  %v329_v25 = vld [vmem:[#allocation2 + $0x7f0] sm:$0xff] }
  0xbd   :  { %1231 = vmatprep.subr.bf16.mxu1 %v1230_v18  ;;  %v1178_v17 = vpack.c.bf16 %v326_v15, %v324_v14  ;;  %v323_v18 = vld [vmem:[#allocation2 + $0x7c0] sm:$0xff]  ;;  %v1184_v26 = vpack.c.bf16 %v329_v25, %v327_v24  ;;  %v784_v14 = vld [vmem:[#allocation6 + $0x30] sm:$0xff]  ;;  %v785_v15 = vld [vmem:[#allocation6 + $0x38] sm:$0xff] }
  0xbe   :  { %1129 = vmatpush1.bf16.msra.mxu0 %v1128_v32  ;;  %v679_v32 = vld [vmem:[#allocation4 + $0x190] sm:$0xff]  ;;  %v1180_v22 = vpack.c.bf16 %v325_v19, %v323_v18  ;;  %v1264_v18 = vpack.c.bf16 %v785_v15, %v784_v14 }
  0xbf   :  { %1131 = vmatprep.subr.bf16.mxu0 %v1130_v37  ;;  %v300_v37 = vld [vmem:[#allocation2 + $0x708] sm:$0xff]  ;;  %v1236_v39 = vpack.c.bf16 %v679_v32, %v677_v31  ;;  %v685_v31 = vld [vmem:[#allocation4 + $0x1c0] sm:$0xff]  ;;  %v687_v32 = vld [vmem:[#allocation4 + $0x1d0] sm:$0xff] }
  0xc0   :  { %1233 = vmatpush1.bf16.msra.mxu1 %v1232_v27  ;;  %v73_v27 = vld [vmem:[%s1505_s0 + $0x30] sm:$0xff] }
  0xc1   :  { %1235 = vmatprep.subr.bf16.mxu1 %v1234_v30 }
  0xc2   :  { %1133 = vmatpush1.bf16.msra.mxu0 %v1132_v44  ;;  %v1154_v44 = vpack.c.bf16 %v302_v38, %v300_v37  ;;  %v689_v37 = vld [vmem:[#allocation4 + $0x1e0] sm:$0xff]  ;;  %v691_v38 = vld [vmem:[#allocation4 + $0x1f0] sm:$0xff] }
  0xc3   :  { %1135 = vmatprep.subr.bf16.mxu0 %v1134_v49  ;;  %v1240_v49 = vpack.c.bf16 %v683_v43, %v681_v42 }
  0xc4   :  { %1237 = vmatpush1.bf16.msra.mxu1 %v1236_v39  ;;  %v1248_v39 = vpack.c.bf16 %v691_v38, %v689_v37  ;;  %v792_v38 = vld [vmem:[#allocation6 + $0x70] sm:$0xff] }
  0xc5   :  { %1239 = vmatprep.subr.bf16.mxu1 %v1238_v41  ;;  %v795_v41 = vld [vmem:[#allocation6 + $0x88] sm:$0xff] }
  0xc6   :  { %1137 = vmatpush1.bf16.msra.mxu0 %v1136_v56  ;;  %v1160_v56 = vpack.c.bf16 %v305_v53, %v303_v52 }
  0xc7   :  { %1139 = vmatprep.subr.bf16.mxu0 %v1138_v61  ;;  %v314_v61 = vld [vmem:[#allocation2 + $0x778] sm:$0xff] }
  0xc8   :  { %1241 = vmatpush1.bf16.msra.mxu1 %v1240_v49  ;;  %v1166_v63 = vpack.c.bf16 %v314_v61, %v312_v60  ;;  %v339_v49 = vsub.s32 1, %v1481_v46  ;;  %v796_v60 = vld [vmem:[#allocation6 + $0x90] sm:$0xff]  ;;  %v797_v61 = vld [vmem:[#allocation6 + $0x98] sm:$0xff] }
  0xca   :  { %1141 = vmatpush1.bf16.msra.mxu0 %v1140_v4  ;;  %v1168_v4 = vpack.c.bf16 %v313_v1, %v311_v0  ;;  %v1254_v1 = vpack.c.bf16 %v797_v61, %v796_v60 }
  0xcb   :  { %1143 = vmatprep.subr.bf16.mxu0 %v1142_v9  ;;  %v322_v9 = vld [vmem:[#allocation2 + $0x7b8] sm:$0xff] }
  0xcc   :  { %v1174_v11 = vpack.c.bf16 %v322_v9, %v320_v8  ;;  %v782_v8 = vld [vmem:[#allocation6 + $0x20] sm:$0xff]  ;;  %v783_v9 = vld [vmem:[#allocation6 + $0x28] sm:$0xff] }
  0xce   :  { %1145 = vmatpush1.bf16.msra.mxu0 %v1144_v16  ;;  %v1176_v16 = vpack.c.bf16 %v321_v13, %v319_v12  ;;  %v1260_v12 = vpack.c.bf16 %v783_v9, %v782_v8 }
  0xcf   :  { %1147 = vmatprep.subr.bf16.mxu0 %v1146_v21  ;;  %v330_v21 = vld [vmem:[#allocation2 + $0x7f8] sm:$0xff] }
  0xd0   :  { %v1182_v23 = vpack.c.bf16 %v330_v21, %v328_v20  ;;  %v786_v20 = vld [vmem:[#allocation6 + $0x40] sm:$0xff]  ;;  %v787_v21 = vld [vmem:[#allocation6 + $0x48] sm:$0xff] }
  0xd1   :  { %v1268_v24 = vpack.c.bf16 %v787_v21, %v786_v20 }
  0xd2   :  { %1149 = vmatpush1.bf16.msra.mxu0 %v1148_v28  ;;  %v686_v28 = vld [vmem:[#allocation4 + $0x1c8] sm:$0xff] }
  0xd3   :  { %1151 = vmatprep.subr.bf16.mxu0 %v1150_v33  ;;  %v1242_v30 = vpack.c.bf16 %v688_v29, %v686_v28  ;;  %v1244_v33 = vpack.c.bf16 %v687_v32, %v685_v31  ;;  %v806_v28 = vld [vmem:[#allocation6 + $0xe0] sm:$0xff]  ;;  %v807_v29 = vld [vmem:[#allocation6 + $0xe8] sm:$0xff] }
  0xd4   :  { %v1274_v31 = vpack.c.bf16 %v807_v29, %v806_v28  ;;  %v790_v32 = vld [vmem:[#allocation6 + $0x60] sm:$0xff] }
  0xd5   :  { %1243 = vmatprep.subr.bf16.mxu1 %v1242_v30 }
  0xd6   :  { %1153 = vmatpush1.bf16.msra.mxu0 %v1152_v40  ;;  %1245 = vmatpush1.bf16.msra.mxu1 %v1244_v33  ;;  %v794_v40 = vld [vmem:[#allocation6 + $0x80] sm:$0xff]  ;;  %v791_v33 = vld [vmem:[#allocation6 + $0x68] sm:$0xff] }
  0xd7   :  { %1155 = vmatprep.subr.bf16.mxu0 %v1154_v44  ;;  %1247 = vmatprep.subr.bf16.mxu1 %v1246_v36  ;;  %v1250_v42 = vpack.c.bf16 %v795_v41, %v794_v40  ;;  %v1276_v34 = vpack.c.bf16 %v791_v33, %v790_v32  ;;  %v809_v36 = vld [vmem:[#allocation6 + $0xf8] sm:$0xff]  ;;  %v693_v41 = vld [vmem:[%s1509_s4] sm:$0x3] }
  0xd8   :  { %v1278_v37 = vpack.c.bf16 %v809_v36, %v808_v35 }
  0xda   :  { %1157 = vmatpush1.bf16.msra.mxu0 %v1156_v50  ;;  %1249 = vmatpush1.bf16.msra.mxu1 %v1248_v39  ;;  %v336_v50 = vrot.slane %v331_v48, %v335_v47  ;;  %v793_v39 = vld [vmem:[#allocation6 + $0x78] sm:$0xff] }
  0xdb   :  { %1159 = vmatprep.subr.bf16.mxu0 %v1158_v51  ;;  %1251 = vmatprep.subr.bf16.mxu1 %v1250_v42  ;;  %v340_v51 = vrot.slane %v331_v48, %v339_v49  ;;  %v1280_v40 = vpack.c.bf16 %v793_v39, %v792_v38  ;;  %v698_v42 = vrot.slane %v693_v41, %v335_v47 }
  0xde   :  { %1161 = vmatpush1.bf16.msra.mxu0 %v1160_v56 }
  0xdf   :  { %1163 = vmatprep.subr.bf16.mxu0 %v1162_v57  ;;  %v778_v57 = vld [vmem:[#allocation6] sm:$0xff] }
  0xe2   :  { %1165 = vmatpush1.bf16.msra.mxu0 %v1164_v62 }
  0xe3   :  { %1167 = vmatprep.subr.bf16.mxu0 %v1166_v63  ;;  %v1252_v63 = vpack.c.bf16 %v779_v58, %v778_v57 }
  0xe6   :  { %1169 = vmatpush1.bf16.msra.mxu0 %v1168_v4  ;;  %v798_v4 = vld [vmem:[#allocation6 + $0xa0] sm:$0xff] }
  0xe7   :  { %1171 = vmatprep.subr.bf16.mxu0 %v1170_v5  ;;  %v799_v5 = vld [vmem:[#allocation6 + $0xa8] sm:$0xff] }
  0xe8   :  { %v1258_v7 = vpack.c.bf16 %v799_v5, %v798_v4 }
  0xea   :  { %1173 = vmatpush1.bf16.msra.mxu0 %v1172_v10  ;;  %v800_v10 = vld [vmem:[#allocation6 + $0xb0] sm:$0xff] }
  0xeb   :  { %1175 = vmatprep.subr.bf16.mxu0 %v1174_v11  ;;  %v801_v11 = vld [vmem:[#allocation6 + $0xb8] sm:$0xff] }
  0xec   :  { %v1262_v13 = vpack.c.bf16 %v801_v11, %v800_v10 }
  0xee   :  { %1177 = vmatpush1.bf16.msra.mxu0 %v1176_v16  ;;  %v802_v16 = vld [vmem:[#allocation6 + $0xc0] sm:$0xff] }
  0xef   :  { %1179 = vmatprep.subr.bf16.mxu0 %v1178_v17  ;;  %v803_v17 = vld [vmem:[#allocation6 + $0xc8] sm:$0xff] }
  0xf0   :  { %v1266_v19 = vpack.c.bf16 %v803_v17, %v802_v16 }
  0xf2   :  { %1181 = vmatpush1.bf16.msra.mxu0 %v1180_v22  ;;  %v804_v22 = vld [vmem:[#allocation6 + $0xd0] sm:$0xff] }
  0xf3   :  { %1183 = vmatprep.subr.bf16.mxu0 %v1182_v23  ;;  %v805_v23 = vld [vmem:[#allocation6 + $0xd8] sm:$0xff] }
  0xf4   :  { %v1270_v25 = vpack.c.bf16 %v805_v23, %v804_v22 }
  0xf6   :  { %1185 = vmatpush1.bf16.msra.mxu0 %v1184_v26  ;;  %v788_v26 = vld [vmem:[#allocation6 + $0x50] sm:$0xff] }
  0xf9   :  { %621 = vmatmul.mubr.f32.vlgmr.msra.gmra.mrb[0].mxu0 %v73_v27  ;;  %v789_v27 = vld [vmem:[#allocation6 + $0x58] sm:$0xff] }
  0xfa   :  { %v1272_v30 = vpack.c.bf16 %v789_v27, %v788_v26 }
 0x166   :  { %v409_v43 = vpop.f32.mrb[0].mxu1 }
 0x167   :  { %v411_v44 = vpop.f32.mrb[1].mxu1  ;;  %v410_v52 = vadd.f32 %v409_v43, %v336_v50  ;;  %v702_v43 = vrot.slane %v693_v41, %v339_v49 }
 0x168   :  { %v412_v53 = vadd.f32 %v411_v44, %v340_v51 }
 0x1cc   :  { %v622_v54 = vpop.f32.mrb[0].mxu0 }
 0x1cd   :  { %v1283_v55 = vadd.f32 %v622_v54, %v410_v52  ;;  %v624_v56 = vpop.f32.mrb[1].mxu0  ;;  %v894_v54 = vld [vmem:[%s1511_s6] ss:$0 sm:$0xff] }
 0x1ce   :  { %v1285_v59 = vadd.f32 %v624_v56, %v412_v53 }
 0x1cf   :  { %v627_v0 = vmax.f32 %v1283_v55, 0.0 }
 0x1d0   :  { %v628_v62 = vmax.f32 %v1285_v59, 0.0 }
 0x1d2   :  { %769 = vmatprep.mubr.f32.mxu1 %v628_v62 }
 0x1d3   :  { %770 = vmatmul.mubr.f32.vlgmr.msra.gmra.mrb[2].mxu1 %v627_v0 }
 0x1d4   :  { %1253 = vmatpush3.bf16.msra.mxu1 %v1252_v63 }
 0x1d5   :  { %1255 = vmatprep.subr.bf16.mxu1 %v1254_v1 }
 0x1d8   :  { %1257 = vmatpush3.bf16.msra.mxu1 %v1256_v6 }
 0x1d9   :  { %1259 = vmatprep.subr.bf16.mxu1 %v1258_v7 }
 0x1dc   :  { %1261 = vmatpush3.bf16.msra.mxu1 %v1260_v12 }
 0x1dd   :  { %1263 = vmatprep.subr.bf16.mxu1 %v1262_v13 }
 0x1e0   :  { %1265 = vmatpush3.bf16.msra.mxu1 %v1264_v18 }
 0x1e1   :  { %1267 = vmatprep.subr.bf16.mxu1 %v1266_v19 }
 0x1e4   :  { %1269 = vmatpush3.bf16.msra.mxu1 %v1268_v24 }
 0x1e5   :  { %1271 = vmatprep.subr.bf16.mxu1 %v1270_v25 }
 0x1e8   :  { %1273 = vmatpush3.bf16.msra.mxu1 %v1272_v30 }
 0x1e9   :  { %1275 = vmatprep.subr.bf16.mxu1 %v1274_v31 }
 0x1ec   :  { %1277 = vmatpush3.bf16.msra.mxu1 %v1276_v34 }
 0x1ed   :  { %1279 = vmatprep.subr.bf16.mxu1 %v1278_v37 }
 0x1f0   :  { %1281 = vmatpush3.bf16.msra.mxu1 %v1280_v40 }
 0x2a6   :  { %v771_v44 = vpop.f32.mrb[2].mxu1 }
 0x2a7   :  { %v772_v45 = vadd.f32 %v771_v44, %v698_v42  ;;  %v773_v48 = vpop.f32.mrb[3].mxu1 }
 0x2a8   :  { %v774_v50 = vadd.f32 %v773_v48, %v702_v43 }
 0x2a9   :  { %v776_v52 = vmax.f32 %v772_v45, 0.0 }
 0x2aa   :  { %v777_v51 = vmax.f32 %v774_v50, 0.0 }
 0x2ac   :  { %881 = vmatprep.mubr.f32.mxu1 %v777_v51 }
 0x2ad   :  { %882 = vmatmul.mubr.f32.vlgmr.msra.gmra.mrb[4].mxu1 %v776_v52 }
 0x380   :  { %v927_v53 = vpop.f32.mrb[4].mxu1 }
 0x381   :  { %v928_v55 = vpop.f32.mrb[5].mxu1 }
 0x382   :  { %v929_v56 = vadd.f32 %v928_v55, %v927_v53 }
 0x384   :  { %v884_v57 = vadd.f32 %v929_v56, %v894_v54 }
 0x386   :  { %887 = vst [vmem:[%s1512_s7] sm:$0xff] %v884_v57 }
 0x387   :  { %892 = vsyncpa [#allocation3], 1 }
 0x388   :  { %893 = vsyncpa [#allocation5], 1 }

</bundles_post_ra>
